<compile_context>
chip_gen: v7x
topology: tpu7x:2x2x1
jax: 0.10.0
libtpu: 0.0.40
codegen_flags: <defaults>
</compile_context>

<pallas_src>
import functools

import jax
import jax.numpy as jnp
from jax.experimental import pallas as pl
from jax.experimental.pallas import tpu as pltpu

_LN_EPS = 1e-5
_INV_SQRT2 = 0.7071067811865476


def _round_up(x, m):
    return (x + m - 1) // m * m


def _gelu_exact(x):
    # nn.GELU() default (approximate='none'): 0.5*x*(1+erf(x/sqrt(2)))
    return 0.5 * x * (1.0 + jax.lax.erf(x * _INV_SQRT2))


def _layernorm_gelu(h, gamma, beta, n_feat):
    """One-pass LN stats over the lane axis (divisor = real feature count)."""
    inv_n = 1.0 / float(n_feat)
    s1 = jnp.sum(h, axis=-1, keepdims=True)
    s2 = jnp.sum(h * h, axis=-1, keepdims=True)
    mean = s1 * inv_n
    var = jnp.maximum(s2 * inv_n - mean * mean, 0.0)
    hn = (h - mean) * jax.lax.rsqrt(var + _LN_EPS)
    hn = hn * gamma + beta          # padded gamma/beta are 0 -> padded cols stay 0
    return _gelu_exact(hn)


def _mlp_block_kernel(x_ref, w1_ref, gamma_ref, beta_ref, o_ref, *, n_feat):
    # Linear (no bias); operands may be bf16, accumulate in f32 on the MXU.
    h = jnp.dot(x_ref[...], w1_ref[...], preferred_element_type=jnp.float32)
    g = _layernorm_gelu(h, gamma_ref[...], beta_ref[...], n_feat)
    o_ref[...] = g.astype(o_ref.dtype)


def _mlp_block_last_affine_kernel(x_ref, w1_ref, gamma_ref, beta_ref, w2_ref,
                                  o_ref, *, n_feat):
    h = jnp.dot(x_ref[...], w1_ref[...], preferred_element_type=jnp.float32)
    g = _layernorm_gelu(h, gamma_ref[...], beta_ref[...], n_feat)
    out = jnp.dot(g.astype(w2_ref.dtype), w2_ref[...],
                  preferred_element_type=jnp.float32)
    o_ref[...] = out.astype(o_ref.dtype)


def _tile_and_vmem(M, c_in_p, c_out_p, mm_bytes, last_affine):
    """Largest row tile fitting a conservative VMEM budget (+ explicit limit)."""
    # Per-row cost: double-buffered x/out tiles + f32 h (+ g) intermediates.
    per_row = (2 * c_in_p * mm_bytes
               + 2 * c_out_p * 4
               + (2 if last_affine else 1) * c_out_p * 4)
    # Resident weights / gamma / beta (count x2 for buffering slack).
    w_bytes = 2 * (c_in_p * c_out_p * mm_bytes + 2 * c_out_p * 4)
    if last_affine:
        w_bytes += 2 * c_out_p * c_out_p * mm_bytes
    budget = 32 * 1024 * 1024        # tile budget, safe on v5e/v6e/v7x
    tm = (budget - w_bytes) // max(per_row, 1)
    tm = max(8, min(512, (tm // 8) * 8))
    tm = min(tm, _round_up(M, 8))
    vmem_limit = tm * per_row + w_bytes + (4 << 20)
    vmem_limit = int(min(48 * 1024 * 1024, max(16 * 1024 * 1024, vmem_limit)))
    return tm, vmem_limit


@functools.partial(jax.jit, static_argnames=("last_affine", "matmul_dtype"))
def mlp_block_forward(x, params, *, last_affine=False, matmul_dtype=jnp.float32):
    """x: (..., c_in) float32.  params: dict of weights (see init_params)."""
    c_in = x.shape[-1]
    c_out = params["w1"].shape[1]
    lead = x.shape[:-1]

    # ---- lane-dense padding of the feature dims (multiples of 128) ----
    c_in_p = _round_up(c_in, 128)
    c_out_p = _round_up(c_out, 128)
    mm_bytes = jnp.dtype(matmul_dtype).itemsize

    x2d = x.reshape(-1, c_in)
    M = x2d.shape[0]

    tm, vmem_limit = _tile_and_vmem(M, c_in_p, c_out_p, mm_bytes, last_affine)
    grid_m = pl.cdiv(M, tm)
    M_pad = grid_m * tm

    # Zero-pad rows/features; cast MXU operands (keep LN/GELU math in f32).
    x_p = jnp.pad(x2d, ((0, M_pad - M), (0, c_in_p - c_in))).astype(matmul_dtype)
    w1_p = jnp.pad(params["w1"],
                   ((0, c_in_p - c_in), (0, c_out_p - c_out))).astype(matmul_dtype)
    gamma_p = jnp.pad(params["gamma"], (0, c_out_p - c_out)).reshape(1, c_out_p)
    beta_p = jnp.pad(params["beta"], (0, c_out_p - c_out)).reshape(1, c_out_p)

    # ---- BlockSpecs: row-tiled x/out, VMEM-resident weights ----
    x_spec = pl.BlockSpec((tm, c_in_p), lambda i: (i, 0))
    w1_spec = pl.BlockSpec((c_in_p, c_out_p), lambda i: (0, 0))
    vec_spec = pl.BlockSpec((1, c_out_p), lambda i: (0, 0))
    out_spec = pl.BlockSpec((tm, c_out_p), lambda i: (i, 0))

    flops = 2 * M_pad * c_in_p * c_out_p
    bytes_accessed = (M_pad * c_in_p * mm_bytes + c_in_p * c_out_p * mm_bytes
                      + 2 * c_out_p * 4 + M_pad * c_out_p * 4)
    if last_affine:
        flops += 2 * M_pad * c_out_p * c_out_p
        bytes_accessed += c_out_p * c_out_p * mm_bytes
    cost = pl.CostEstimate(flops=flops,
                           transcendentals=M_pad * c_out_p,
                           bytes_accessed=bytes_accessed)
    cparams = pltpu.CompilerParams(dimension_semantics=("parallel",),
                                   vmem_limit_bytes=vmem_limit)

    if last_affine:
        w2_p = jnp.pad(params["w2"],
                       ((0, c_out_p - c_out), (0, c_out_p - c_out))).astype(matmul_dtype)
        out_p = pl.pallas_call(
            functools.partial(_mlp_block_last_affine_kernel, n_feat=c_out),
            out_shape=jax.ShapeDtypeStruct((M_pad, c_out_p), x.dtype),
            grid=(grid_m,),
            in_specs=[x_spec, w1_spec, vec_spec, vec_spec, w2_spec := pl.BlockSpec(
                (c_out_p, c_out_p), lambda i: (0, 0))],
            out_specs=out_spec,
            compiler_params=cparams,
            cost_estimate=cost,
        )(x_p, w1_p, gamma_p, beta_p, w2_p)
    else:
        out_p = pl.pallas_call(
            functools.partial(_mlp_block_kernel, n_feat=c_out),
            out_shape=jax.ShapeDtypeStruct((M_pad, c_out_p), x.dtype),
            grid=(grid_m,),
            in_specs=[x_spec, w1_spec, vec_spec, vec_spec],
            out_specs=out_spec,
            compiler_params=cparams,
            cost_estimate=cost,
        )(x_p, w1_p, gamma_p, beta_p)

    return out_p[:M, :c_out].reshape(*lead, c_out)


def init_params(key, c_in, c_out, last_affine=False):
    k1, k2 = jax.random.split(key)
    # Deterministic synthetic init (kaiming-uniform-ish range like nn.Linear).
    bound1 = 1.0 / jnp.sqrt(c_in)
    params = {
        "w1": jax.random.uniform(k1, (c_in, c_out), jnp.float32, -bound1, bound1),
        "gamma": jnp.ones((c_out,), jnp.float32),   # LayerNorm default init
        "beta": jnp.zeros((c_out,), jnp.float32),
    }
    if last_affine:
        bound2 = 1.0 / jnp.sqrt(c_out)
        params["w2"] = jax.random.uniform(k2, (c_out, c_out), jnp.float32,
                                          -bound2, bound2)
    return params


def _reference(x, params, last_affine):
    h = x @ params["w1"]
    mean = jnp.mean(h, axis=-1, keepdims=True)
    var = jnp.mean(jnp.square(h - mean), axis=-1, keepdims=True)
    hn = (h - mean) / jnp.sqrt(var + _LN_EPS)
    hn = hn * params["gamma"] + params["beta"]
    g = jax.nn.gelu(hn, approximate=False)
    if last_affine:
        g = g @ params["w2"]
    return g


if __name__ == "__main__":
    key = jax.random.PRNGKey(0)
    kx, kp = jax.random.split(key)

    batch, seq, c_in, c_out = 2, 8, 16, 32
    x = jax.random.normal(kx, (batch, seq, c_in), jnp.float32)

    # last_affine=False path (module defaults), f32 MXU operands.
    p0 = init_params(kp, c_in, c_out, last_affine=False)
    y0 = jax.block_until_ready(mlp_block_forward(x, p0, last_affine=False))
    r0 = _reference(x, p0, False)
    assert y0.shape == (batch, seq, c_out)
    assert jnp.allclose(y0, r0, atol=1e-4, rtol=1e-4), float(jnp.max(jnp.abs(y0 - r0)))

    # last_affine=True path, f32 MXU operands.
    p1 = init_params(kp, c_in, c_out, last_affine=True)
    y1 = jax.block_until_ready(mlp_block_forward(x, p1, last_affine=True))
    r1 = _reference(x, p1, True)
    assert y1.shape == (batch, seq, c_out)
    assert jnp.allclose(y1, r1, atol=1e-4, rtol=1e-4), float(jnp.max(jnp.abs(y1 - r1)))

    # bf16 MXU operands (v6e/v7x fast path); LN/GELU still f32 -> loose tolerance.
    y2 = jax.block_until_ready(
        mlp_block_forward(x, p1, last_affine=True, matmul_dtype=jnp.bfloat16))
    assert y2.shape == (batch, seq, c_out)
    assert jnp.allclose(y2, r1, atol=3e-2, rtol=3e-2), float(jnp.max(jnp.abs(y2 - r1)))

    print("KERNEL_OK")
</pallas_src>

<mosaic_0001>
module attributes {stable_mosaic.version = 11 : i64} {
  func.func @_mlp_block_kernel(%arg0: i32, %arg1: memref<16x128xf32, #tpu.memory_space<vmem>>, %arg2: memref<128x128xf32, #tpu.memory_space<vmem>>, %arg3: memref<1x128xf32, #tpu.memory_space<vmem>>, %arg4: memref<1x128xf32, #tpu.memory_space<vmem>>, %arg5: memref<16x128xf32, #tpu.memory_space<vmem>>) attributes {dimension_semantics = [#tpu.dimension_semantics<parallel>], iteration_bounds = array<i64: 1>, scalar_prefetch = 0 : i64, scratch_operands = 0 : i64, tpu.core_type = #tpu.core_type<tc>, window_params = [{transform_indices = @transform_0, window_bounds = array<i64: 16, 128>}, {pipeline_mode = #tpu.pipeline_mode<synchronous>, transform_indices = @transform_1, window_bounds = array<i64: 128, 128>}, {pipeline_mode = #tpu.pipeline_mode<synchronous>, transform_indices = @transform_2, window_bounds = array<i64: 1, 128>}, {pipeline_mode = #tpu.pipeline_mode<synchronous>, transform_indices = @transform_3, window_bounds = array<i64: 1, 128>}, {transform_indices = @transform_4, window_bounds = array<i64: 16, 128>}]} {
    %c0 = arith.constant 0 : index
    %c0_0 = arith.constant 0 : index
    %0 = vector.load %arg1[%c0, %c0_0] : memref<16x128xf32, #tpu.memory_space<vmem>>, vector<16x128xf32>
    %c0_1 = arith.constant 0 : index
    %c0_2 = arith.constant 0 : index
    %1 = vector.load %arg2[%c0_1, %c0_2] : memref<128x128xf32, #tpu.memory_space<vmem>>, vector<128x128xf32>
    %cst = arith.constant dense<0.000000e+00> : vector<16x128xf32>
    %2 = tpu.matmul %0, %1, %cst {dimension_numbers = #tpu.dot_dimension_numbers<[1], [0], [0], [1], [0, 0, 1, 1], [], []>} : vector<16x128xf32>, vector<128x128xf32>, vector<16x128xf32> -> vector<16x128xf32>
    %c0_3 = arith.constant 0 : index
    %c0_4 = arith.constant 0 : index
    %3 = vector.load %arg3[%c0_3, %c0_4] : memref<1x128xf32, #tpu.memory_space<vmem>>, vector<1x128xf32>
    %c0_5 = arith.constant 0 : index
    %c0_6 = arith.constant 0 : index
    %4 = vector.load %arg4[%c0_5, %c0_6] : memref<1x128xf32, #tpu.memory_space<vmem>>, vector<1x128xf32>
    %cst_7 = arith.constant dense<0.000000e+00> : vector<16xf32>
    %5 = vector.multi_reduction <add>, %2, %cst_7 [1] : vector<16x128xf32> to vector<16xf32>
    %6 = vector.shape_cast %5 : vector<16xf32> to vector<16x1xf32>
    %7 = arith.mulf %2, %2 : vector<16x128xf32>
    %cst_8 = arith.constant dense<0.000000e+00> : vector<16xf32>
    %8 = vector.multi_reduction <add>, %7, %cst_8 [1] : vector<16x128xf32> to vector<16xf32>
    %9 = vector.shape_cast %8 : vector<16xf32> to vector<16x1xf32>
    %cst_9 = arith.constant 3.125000e-02 : f32
    %10 = vector.broadcast %cst_9 : f32 to vector<16x1xf32>
    %11 = arith.mulf %6, %10 : vector<16x1xf32>
    %cst_10 = arith.constant 3.125000e-02 : f32
    %12 = vector.broadcast %cst_10 : f32 to vector<16x1xf32>
    %13 = arith.mulf %9, %12 : vector<16x1xf32>
    %14 = arith.mulf %11, %11 : vector<16x1xf32>
    %15 = arith.subf %13, %14 : vector<16x1xf32>
    %cst_11 = arith.constant 0.000000e+00 : f32
    %16 = vector.broadcast %cst_11 : f32 to vector<16x1xf32>
    %17 = arith.maximumf %15, %16 : vector<16x1xf32>
    %18 = vector.broadcast %11 : vector<16x1xf32> to vector<16x128xf32>
    %19 = arith.subf %2, %18 : vector<16x128xf32>
    %cst_12 = arith.constant 9.99999974E-6 : f32
    %20 = vector.broadcast %cst_12 : f32 to vector<16x1xf32>
    %21 = arith.addf %17, %20 : vector<16x1xf32>
    %22 = math.rsqrt %21 : vector<16x1xf32>
    %23 = vector.broadcast %22 : vector<16x1xf32> to vector<16x128xf32>
    %24 = arith.mulf %19, %23 : vector<16x128xf32>
    %25 = vector.broadcast %3 : vector<1x128xf32> to vector<16x128xf32>
    %26 = arith.mulf %24, %25 : vector<16x128xf32>
    %27 = vector.broadcast %4 : vector<1x128xf32> to vector<16x128xf32>
    %28 = arith.addf %26, %27 : vector<16x128xf32>
    %cst_13 = arith.constant 5.000000e-01 : f32
    %29 = vector.broadcast %cst_13 : f32 to vector<16x128xf32>
    %30 = arith.mulf %29, %28 : vector<16x128xf32>
    %cst_14 = arith.constant 0.707106769 : f32
    %31 = vector.broadcast %cst_14 : f32 to vector<16x128xf32>
    %32 = arith.mulf %28, %31 : vector<16x128xf32>
    %33 = math.erf %32 : vector<16x128xf32>
    %cst_15 = arith.constant 1.000000e+00 : f32
    %34 = vector.broadcast %cst_15 : f32 to vector<16x128xf32>
    %35 = arith.addf %34, %33 : vector<16x128xf32>
    %36 = arith.mulf %30, %35 : vector<16x128xf32>
    %c0_16 = arith.constant 0 : index
    %c0_17 = arith.constant 0 : index
    %37 = vector.load %arg5[%c0_16, %c0_17] : memref<16x128xf32, #tpu.memory_space<vmem>>, vector<16x128xf32>
    tpu.vector_store %arg5[%c0_16, %c0_17], %36 {strides = array<i32>} : memref<16x128xf32, #tpu.memory_space<vmem>>, vector<16x128xf32>,
    return
  }
  func.func @transform_0(%arg0: i32) -> (i32, i32) {
    %c0_i32 = arith.constant 0 : i32
    %c0_i32_0 = arith.constant 0 : i32
    return %arg0, %c0_i32 : i32, i32
  }
  func.func @transform_1(%arg0: i32) -> (i32, i32) {
    %c0_i32 = arith.constant 0 : i32
    %c0_i32_0 = arith.constant 0 : i32
    %c0_i32_1 = arith.constant 0 : i32
    return %c0_i32, %c0_i32_0 : i32, i32
  }
  func.func @transform_2(%arg0: i32) -> (i32, i32) {
    %c0_i32 = arith.constant 0 : i32
    %c0_i32_0 = arith.constant 0 : i32
    %c0_i32_1 = arith.constant 0 : i32
    return %c0_i32, %c0_i32_0 : i32, i32
  }
  func.func @transform_3(%arg0: i32) -> (i32, i32) {
    %c0_i32 = arith.constant 0 : i32
    %c0_i32_0 = arith.constant 0 : i32
    %c0_i32_1 = arith.constant 0 : i32
    return %c0_i32, %c0_i32_0 : i32, i32
  }
  func.func @transform_4(%arg0: i32) -> (i32, i32) {
    %c0_i32 = arith.constant 0 : i32
    %c0_i32_0 = arith.constant 0 : i32
    return %arg0, %c0_i32 : i32, i32
  }
}

</mosaic_0001>

<bundles_post_ra>
// kernel: mlp_block_forward.1
= control target key start
LH: loop header
LB: loop body
LE: loop exit
PB: predicated region body
PF: predicated region fallthrough
CT: control target
= control target key end

     0   :  { %s358_s1 = inlined_call_operand.vmem [shape: f32[128,128], index: 1, kind: input, shape index: {}]   ;;  %s359_s0 = inlined_call_operand.vmem [shape: f32[16,128], index: 0, kind: input, shape index: {}]   ;;  %s360_s2 = inlined_call_operand.vmem [shape: f32[1,128], index: 2, kind: input, shape index: {}]   ;;  %s361_s3 = inlined_call_operand.vmem [shape: f32[1,128], index: 3, kind: input, shape index: {}]   ;;  %s362_s4 = inlined_call_operand.vmem [shape: f32[16,128], index: 4, kind: output, shape index: {}]  }
   0x1   :  { %v19_v0 = vld [vmem:[%s358_s1] sm:$0xff]  ;;  %v20_v1 = vld [vmem:[%s358_s1 + $0x8] sm:$0xff]  ;;  %v21_v2 = vld [vmem:[%s358_s1 + $0x10] sm:$0xff] }
   0x2   :  { %v227_v3 = vpack.c.bf16 %v20_v1, %v19_v0  ;;  %v22_v4 = vld [vmem:[%s358_s1 + $0x18] sm:$0xff]  ;;  %v23_v6 = vld [vmem:[%s358_s1 + $0x20] sm:$0xff]  ;;  %v24_v7 = vld [vmem:[%s358_s1 + $0x28] sm:$0xff] }
   0x3   :  { %v231_v5 = vpack.c.bf16 %v22_v4, %v21_v2  ;;  %v235_v8 = vpack.c.bf16 %v24_v7, %v23_v6  ;;  %v17_v9 = vld [vmem:[%s359_s0] sm:$0xff]  ;;  %v25_v10 = vld [vmem:[%s358_s1 + $0x30] sm:$0xff]  ;;  %v26_v11 = vld [vmem:[%s358_s1 + $0x38] sm:$0xff] }
   0x4   :  { %228 = vmatprep.subr.bf16.mxu0 %v227_v3  ;;  %224 = vmatprep.mubr.f32.mxu0 %v17_v9  ;;  %v239_v12 = vpack.c.bf16 %v26_v11, %v25_v10  ;;  %v27_v13 = vld [vmem:[%s358_s1 + $0x40] sm:$0xff]  ;;  %v28_v14 = vld [vmem:[%s358_s1 + $0x48] sm:$0xff]  ;;  %v29_v16 = vld [vmem:[%s358_s1 + $0x50] sm:$0xff] }
   0x5   :  { %230 = vmatpush3.bf16.msra.mxu0 %v227_v3  ;;  %v243_v15 = vpack.c.bf16 %v28_v14, %v27_v13  ;;  %v30_v17 = vld [vmem:[%s358_s1 + $0x58] sm:$0xff]  ;;  %v31_v19 = vld [vmem:[%s358_s1 + $0x60] sm:$0xff]  ;;  %v32_v20 = vld [vmem:[%s358_s1 + $0x68] sm:$0xff] }
   0x6   :  { %232 = vmatprep.subr.bf16.mxu0 %v231_v5  ;;  %v247_v18 = vpack.c.bf16 %v30_v17, %v29_v16  ;;  %v251_v21 = vpack.c.bf16 %v32_v20, %v31_v19  ;;  %v33_v22 = vld [vmem:[%s358_s1 + $0x70] sm:$0xff]  ;;  %v34_v23 = vld [vmem:[%s358_s1 + $0x78] sm:$0xff]  ;;  %v18_v25 = vld [vmem:[%s359_s0 + $0x8] sm:$0xff] }
   0x7   :  { %v255_v24 = vpack.c.bf16 %v34_v23, %v33_v22  ;;  %v172_v48 = vld [vmem:[%s360_s2] ss:$0 sm:$0xff] }
   0x8   :  { %v173_v50 = vld [vmem:[%s361_s3] ss:$0 sm:$0xff] }
   0x9   :  { %234 = vmatpush3.bf16.msra.mxu0 %v231_v5 }
   0xa   :  { %236 = vmatprep.subr.bf16.mxu0 %v235_v8 }
   0xd   :  { %238 = vmatpush3.bf16.msra.mxu0 %v235_v8 }
   0xe   :  { %240 = vmatprep.subr.bf16.mxu0 %v239_v12 }
  0x11   :  { %242 = vmatpush3.bf16.msra.mxu0 %v239_v12 }
  0x12   :  { %244 = vmatprep.subr.bf16.mxu0 %v243_v15 }
  0x15   :  { %246 = vmatpush3.bf16.msra.mxu0 %v243_v15 }
  0x16   :  { %248 = vmatprep.subr.bf16.mxu0 %v247_v18 }
  0x19   :  { %250 = vmatpush3.bf16.msra.mxu0 %v247_v18 }
  0x1a   :  { %252 = vmatprep.subr.bf16.mxu0 %v251_v21 }
  0x1d   :  { %254 = vmatpush3.bf16.msra.mxu0 %v251_v21 }
  0x1e   :  { %256 = vmatprep.subr.bf16.mxu0 %v255_v24 }
  0x21   :  { %258 = vmatpush3.bf16.msra.mxu0 %v255_v24 }
  0x24   :  { %225 = vmatmul.mubr.f32.vlgmr.msra.gmra.mrb[0].mxu0 %v18_v25 }
  0xf7   :  { %v226_v26 = vpop.f32.mrb[0].mxu0 }
  0xf8   :  { %v101_v27 = vpop.f32.mrb[1].mxu0  ;;  %v117_v29 = vmul.f32 %v226_v26, %v226_v26 }
  0xf9   :  { %112 = vadd.xlane.f32.xlu0 %v101_v27  ;;  %v116_v28 = vmul.f32 %v101_v27, %v101_v27 }
  0xfb   :  { %118 = vadd.xlane.f32.xlu1 %v116_v28 }
  0xfd   :  { %114 = vadd.xlane.f32.xlu0 %v226_v26 }
  0xff   :  { %120 = vadd.xlane.f32.xlu1 %v117_v29 }
 0x186   :  { %v113_v30 = vpop.xlane.xlu0 %112 }
 0x187   :  { %v122_v31 = vmul.f32 0.03125, %v113_v30 }
 0x188   :  { %v119_v32 = vpop.xlane.xlu1 %118 }
 0x189   :  { %v126_v33 = vmul.f32 %v122_v31, %v122_v31  ;;  %v124_v34 = vmul.f32 0.03125, %v119_v32  ;;  %v132_v46 = vsub.f32 %v101_v27, %v122_v31 }
 0x18a   :  { %v115_v35 = vpop.xlane.xlu0 %114 }
 0x18b   :  { %v128_v36 = vsub.f32 %v124_v34, %v126_v33  ;;  %v123_v37 = vmul.f32 0.03125, %v115_v35 }
 0x18c   :  { %v121_v38 = vpop.xlane.xlu1 %120 }
 0x18d   :  { %v130_v39 = vmax.f32 %v128_v36, 0.0  ;;  %v127_v40 = vmul.f32 %v123_v37, %v123_v37  ;;  %v125_v41 = vmul.f32 0.03125, %v121_v38  ;;  %v133_v52 = vsub.f32 %v226_v26, %v123_v37 }
 0x18f   :  { %v134_v42 = vadd.f32 1e-05, %v130_v39  ;;  %v129_v43 = vsub.f32 %v125_v41, %v127_v40 }
 0x191   :  { %259 = vrsqrt.f32 %v134_v42  ;;  %v131_v44 = vmax.f32 %v129_v43, 0.0 }
 0x193   :  { %v135_v45 = vadd.f32 1e-05, %v131_v44 }
 0x195   :  { %261 = vrsqrt.f32 %v135_v45 }
 0x19b   :  { %v260_v47 = vpop.eup %259 }
 0x19c   :  { %v138_v49 = vmul.f32 %v260_v47, %v132_v46 }
 0x19e   :  { %v146_v51 = vmul.f32 %v172_v48, %v138_v49 }
 0x19f   :  { %v262_v53 = vpop.eup %261 }
 0x1a0   :  { %v154_v54 = vadd.f32 %v173_v50, %v146_v51  ;;  %v139_v55 = vmul.f32 %v262_v53, %v133_v52 }
 0x1a2   :  { %v158_v56 = vmul.f32 0.70710677, %v154_v54  ;;  %v147_v57 = vmul.f32 %v172_v48, %v139_v55  ;;  %v156_v61 = vmul.f32 0.5, %v154_v54 }
 0x1a4   :  { %263 = verf.f32 %v158_v56  ;;  %v155_v58 = vadd.f32 %v173_v50, %v147_v57 }
 0x1a6   :  { %v159_v59 = vmul.f32 0.70710677, %v155_v58  ;;  %v157_v1 = vmul.f32 0.5, %v155_v58 }
 0x1a8   :  { %265 = verf.f32 %v159_v59 }
 0x1ae   :  { %v264_v60 = vpop.eup %263 }
 0x1af   :  { %v162_v62 = vadd.f32 1.0, %v264_v60 }
 0x1b1   :  { %v164_v63 = vmul.f32 %v162_v62, %v156_v61 }
 0x1b2   :  { %v266_v0 = vpop.eup %265 }
 0x1b3   :  { %166 = vst [vmem:[%s362_s4] sm:$0xff] %v164_v63  ;;  %v163_v2 = vadd.f32 1.0, %v266_v0 }
 0x1b5   :  { %v165_v3 = vmul.f32 %v163_v2, %v157_v1 }
 0x1b7   :  { %167 = vst [vmem:[%s362_s4 + $0x8] sm:$0xff] %v165_v3 }

</bundles_post_ra>
